<compile_context>
chip_gen: v7x
topology: tpu7x:2x2x1
jax: 0.10.0
libtpu: 0.0.40
codegen_flags: <defaults>
</compile_context>

<pallas_src>
import jax
import jax.numpy as jnp
from jax.experimental import pallas as pl
from jax.experimental.pallas import tpu as pltpu


def _cond_layer_kernel(x_ref, w_ref, b_ref, o_ref):
    # x_ref : (1, Cin, tHW)   channel-major activation tile (HW on lanes)
    # w_ref : (1, Cout, Cin)  per-batch effective 1x1 conv weight (sp folded in)
    # b_ref : (1, Cout, 1)    per-batch effective bias (conv bias + cond bias)
    # o_ref : (1, Cout, tHW)
    y = jnp.dot(w_ref[0], x_ref[0], preferred_element_type=jnp.float32)  # (Cout, tHW)
    o_ref[0] = (y + b_ref[0]).astype(o_ref.dtype)


def conditional_layer_forward(x_nchw, conv_w, conv_b, cond, cond_weight, *, thw=None):
    """ConditionalLayer(Conv2d(Cin, Cout, 1), conditions=K, ver=1).forward.

    x_nchw      : [B, Cin, H, W]  (NCHW, like PyTorch)
    conv_w      : [Cout, Cin]     (1x1 conv weight, kernel dims squeezed)
    conv_b      : [Cout]
    cond        : [B, K]
    cond_weight : [K, 2*Cout]     (ConditionalLayer.weight, ver=1)
    returns     : [B, Cout, H, W]
    """
    B, Cin, H, W = x_nchw.shape
    Cout = conv_w.shape[0]
    HW = H * W

    # Pure reshape (no transpose): channel-major stays channel-major.
    x = x_nchw.reshape(B, Cin, HW)

    # Hoist the tiny condition projection + softplus out of the kernel and
    # fold everything into a per-batch weight/bias:
    #   out = (W x + cb) * sp + cbias = (sp * W) x + (cb * sp + cbias)
    ws = cond_weight[:, :Cout]                               # scale half [K, Cout]
    wb = cond_weight[:, Cout:]                               # bias  half [K, Cout]
    sp = jax.nn.softplus(cond @ ws)                          # [B, Cout]
    w_eff = sp[:, :, None] * conv_w[None, :, :]              # [B, Cout, Cin]
    b_eff = (cond @ wb + conv_b[None, :] * sp)[..., None]    # [B, Cout, 1]
    w_eff = w_eff.astype(x.dtype)

    # HW tile: lane-dense (multiple of 128), sized so double-buffered in+out
    # tiles stay well under the default scoped-VMEM limits (16 MiB on v5e).
    if thw is None:
        budget = 8 * 1024 * 1024                             # bytes for 2x(in+out) tiles
        itemsize = jnp.dtype(x.dtype).itemsize
        max_thw = budget // (2 * (Cin + Cout) * itemsize)
        thw = max(128, min(4096, (max_thw // 128) * 128))
    thw = min(thw, pl.cdiv(HW, 128) * 128)                   # don't over-pad tiny inputs
    HWp = pl.cdiv(HW, thw) * thw
    if HWp != HW:
        x = jnp.pad(x, ((0, 0), (0, 0), (0, HWp - HW)))
    n_hw_tiles = HWp // thw

    out = pl.pallas_call(
        _cond_layer_kernel,
        out_shape=jax.ShapeDtypeStruct((B, Cout, HWp), x.dtype),
        grid_spec=pltpu.PrefetchScalarGridSpec(
            num_scalar_prefetch=0,
            grid=(B, n_hw_tiles),
            in_specs=[
                pl.BlockSpec((1, Cin, thw), lambda b, t: (b, 0, t)),
                pl.BlockSpec((1, Cout, Cin), lambda b, t: (b, 0, 0)),
                pl.BlockSpec((1, Cout, 1), lambda b, t: (b, 0, 0)),
            ],
            out_specs=pl.BlockSpec((1, Cout, thw), lambda b, t: (b, 0, t)),
        ),
        compiler_params=pltpu.CompilerParams(
            dimension_semantics=("parallel", "parallel")),
    )(x, w_eff, b_eff)

    # Drop HW padding (no-op slice if HWp == HW) and restore spatial dims.
    return out[:, :, :HW].reshape(B, Cout, H, W)


def _reference(x_nchw, conv_w, conv_b, cond, cond_weight):
    """Pure-JAX reference mirroring the PyTorch forward."""
    B = x_nchw.shape[0]
    Cout = conv_w.shape[0]
    y = jnp.einsum("bihw,oi->bohw", x_nchw, conv_w) + conv_b[None, :, None, None]
    cproj = cond @ cond_weight                                  # [B, 2*Cout]
    scale = cproj[:, :Cout].reshape(B, Cout, 1, 1)
    bias = cproj[:, Cout:].reshape(B, Cout, 1, 1)
    return y * jax.nn.softplus(scale) + bias


if __name__ == "__main__":
    B, Cin, Cout, H, W, K = 2, 4, 8, 16, 16, 4  # conditions=4

    key = jax.random.PRNGKey(0)
    kx, kc, kw, kb, kcw = jax.random.split(key, 5)

    x = jax.random.normal(kx, (B, Cin, H, W), dtype=jnp.float32)
    cond = jax.random.normal(kc, (B, K), dtype=jnp.float32)

    # Deterministic "init": conv1x1 weight/bias, and kaiming_normal_-style init
    # for ConditionalLayer.weight (fan_in = 2*Cout -> std = sqrt(2/(2*Cout))).
    conv_w = jax.random.normal(kw, (Cout, Cin), dtype=jnp.float32) * (2.0 / Cin) ** 0.5
    conv_b = jax.random.normal(kb, (Cout,), dtype=jnp.float32) * 0.1
    cond_weight = (jax.random.normal(kcw, (K, 2 * Cout), dtype=jnp.float32)
                   * (2.0 / (2 * Cout)) ** 0.5)

    out = conditional_layer_forward(x, conv_w, conv_b, cond, cond_weight)
    out = jax.block_until_ready(out)

    ref = _reference(x, conv_w, conv_b, cond, cond_weight)
    assert out.shape == (B, Cout, H, W), out.shape
    assert jnp.allclose(out, ref, atol=1e-4, rtol=1e-4), float(
        jnp.max(jnp.abs(out - ref)))

    print("KERNEL_OK")
</pallas_src>

<mosaic_0001>
module attributes {stable_mosaic.version = 11 : i64} {
  func.func @_cond_layer_kernel(%arg0: i32, %arg1: i32, %arg2: memref<1x4x256xf32, #tpu.memory_space<vmem>>, %arg3: memref<1x8x4xf32, #tpu.memory_space<vmem>>, %arg4: memref<1x8x1xf32, #tpu.memory_space<vmem>>, %arg5: memref<1x8x256xf32, #tpu.memory_space<vmem>>) attributes {dimension_semantics = [#tpu.dimension_semantics<parallel>, #tpu.dimension_semantics<parallel>], iteration_bounds = array<i64: 2, 1>, scalar_prefetch = 0 : i64, scratch_operands = 0 : i64, tpu.core_type = #tpu.core_type<tc>, window_params = [{transform_indices = @transform_0, window_bounds = array<i64: 1, 4, 256>}, {transform_indices = @transform_1, window_bounds = array<i64: 1, 8, 4>}, {transform_indices = @transform_2, window_bounds = array<i64: 1, 8, 1>}, {transform_indices = @transform_3, window_bounds = array<i64: 1, 8, 256>}]} {
    %c0 = arith.constant 0 : index
    %c0_0 = arith.constant 0 : index
    %c0_1 = arith.constant 0 : index
    %0 = vector.load %arg3[%c0, %c0_0, %c0_1] : memref<1x8x4xf32, #tpu.memory_space<vmem>>, vector<1x8x4xf32>
    %1 = vector.shape_cast %0 : vector<1x8x4xf32> to vector<8x4xf32>
    %c0_2 = arith.constant 0 : index
    %c0_3 = arith.constant 0 : index
    %c0_4 = arith.constant 0 : index
    %2 = vector.load %arg2[%c0_2, %c0_3, %c0_4] : memref<1x4x256xf32, #tpu.memory_space<vmem>>, vector<1x4x256xf32>
    %3 = vector.shape_cast %2 : vector<1x4x256xf32> to vector<4x256xf32>
    %cst = arith.constant dense<0.000000e+00> : vector<8x256xf32>
    %4 = tpu.matmul %1, %3, %cst {dimension_numbers = #tpu.dot_dimension_numbers<[1], [0], [0], [1], [0, 0, 1, 1], [], []>} : vector<8x4xf32>, vector<4x256xf32>, vector<8x256xf32> -> vector<8x256xf32>
    %c0_5 = arith.constant 0 : index
    %c0_6 = arith.constant 0 : index
    %c0_7 = arith.constant 0 : index
    %5 = vector.load %arg4[%c0_5, %c0_6, %c0_7] : memref<1x8x1xf32, #tpu.memory_space<vmem>>, vector<1x8x1xf32>
    %6 = vector.shape_cast %5 : vector<1x8x1xf32> to vector<8x1xf32>
    %7 = vector.broadcast %6 : vector<8x1xf32> to vector<8x256xf32>
    %8 = arith.addf %4, %7 : vector<8x256xf32>
    %c0_8 = arith.constant 0 : index
    %c0_9 = arith.constant 0 : index
    %c0_10 = arith.constant 0 : index
    %9 = vector.load %arg5[%c0_8, %c0_9, %c0_10] : memref<1x8x256xf32, #tpu.memory_space<vmem>>, vector<1x8x256xf32>
    %10 = vector.shape_cast %9 : vector<1x8x256xf32> to vector<8x256xf32>
    %11 = vector.shape_cast %8 : vector<8x256xf32> to vector<1x8x256xf32>
    tpu.vector_store %arg5[%c0_8, %c0_9, %c0_10], %11 {strides = array<i32>} : memref<1x8x256xf32, #tpu.memory_space<vmem>>, vector<1x8x256xf32>,
    return
  }
  func.func @transform_0(%arg0: i32, %arg1: i32) -> (i32, i32, i32) {
    %c0_i32 = arith.constant 0 : i32
    %c0_i32_0 = arith.constant 0 : i32
    return %arg0, %c0_i32, %arg1 : i32, i32, i32
  }
  func.func @transform_1(%arg0: i32, %arg1: i32) -> (i32, i32, i32) {
    %c0_i32 = arith.constant 0 : i32
    %c0_i32_0 = arith.constant 0 : i32
    %c0_i32_1 = arith.constant 0 : i32
    return %arg0, %c0_i32, %c0_i32_0 : i32, i32, i32
  }
  func.func @transform_2(%arg0: i32, %arg1: i32) -> (i32, i32, i32) {
    %c0_i32 = arith.constant 0 : i32
    %c0_i32_0 = arith.constant 0 : i32
    %c0_i32_1 = arith.constant 0 : i32
    return %arg0, %c0_i32, %c0_i32_0 : i32, i32, i32
  }
  func.func @transform_3(%arg0: i32, %arg1: i32) -> (i32, i32, i32) {
    %c0_i32 = arith.constant 0 : i32
    %c0_i32_0 = arith.constant 0 : i32
    return %arg0, %c0_i32, %arg1 : i32, i32, i32
  }
}

</mosaic_0001>

<bundles_post_ra>
// kernel: tpu_custom_call.1
= control target key start
LH: loop header
LB: loop body
LE: loop exit
PB: predicated region body
PF: predicated region fallthrough
CT: control target
= control target key end

     0   :  { %8 = vsyncpa [#allocation3], 0  ;;  %s743_s0 = inlined_call_operand.vmem [shape: f32[2,4,256], index: 0, kind: input, shape index: {}]   ;;  %s744_s1 = inlined_call_operand.vmem [shape: f32[2,8,4], index: 1, kind: input, shape index: {}]   ;;  %s745_s2 = inlined_call_operand.vmem [shape: f32[2,8,1], index: 2, kind: input, shape index: {}]   ;;  %s746_s3 = inlined_call_operand.hbm [shape: f32[2,8,256], index: 3, kind: output, shape index: {}]  }
   0x1   :  { %10 = vsyncpa [#allocation3 + $0x1], 0  ;;  %s625_s12 = smov 0   ;;  %s627_s13 = smov 0  }
   0x2   :  { %s629_s14 = smov 0   ;;  %s631_s15 = smov 0  }
   0x3   :  { %s633_s16 = smov 0   ;;  %s635_s17 = smov 0  }
   0x4 LB: > { %s443_s18 = sadd.s32 4294967295, %s600_s17   ;;  %s444_s19 = sadd.s32 4294967294, %s600_s17   ;;  %s600_s17 = sphi %s635_s17, %s16_s17   ;;  %s596_s16 = sphi %s633_s16, %s753_s16   ;;  %s592_s15 = sphi %s631_s15, %s752_s15   ;;  %s588_s14 = sphi %s629_s14, %s751_s14   ;;  %s584_s13 = sphi %s627_s13, %s750_s13   ;;  %s580_s12 = sphi %s625_s12, %s749_s12  }
   0x5   : > { %s28_s20 = sadd.s32 1, %s596_s16  ;;  %s117_s21 = sadd.s32 1, %s588_s14 }
   0x6   : > { %p30_p0 = scmp.ge.s32.totalorder %s28_s20, 2  ;;  %p127_p1 = scmp.ne.s32.totalorder %s588_s14, %s584_s13 }
   0x7   : > { %p128_p2 = scmp.eq.s32.totalorder %s443_s18, 1  ;;  %p133_p3 = scmp.ne.s32.totalorder %s584_s13, %s580_s12 }
   0x8   : > { %s755_s20 = smov (%p30_p0, %s28_s20), 0  ;;  %p134_p5 = scmp.eq.s32.totalorder %s444_s19, 1 }
   0x9   : > { %p665_p4 = por %p128_p2, %p127_p1  ;;  %s112_s23 = ssub.s32 %s596_s16, %s755_s20 }
   0xa   : > { %p447_p6 = scmp.ge.s32.totalorder %s600_s17, 1  ;;  %p115_p7 = scmp.eq.s32.totalorder %s112_s23, 0 }
   0xb   : > { %p672_p8 = por %p134_p5, %p133_p3  ;;  %p179_p9 = scmp.lt.s32.totalorder %s600_s17, 3 }
   0xc   : > { %s678_s25 = scalar_select %p115_p7, %s588_s14, %s117_s21  }
   0xd   : > { %p180_p10 = pnand %p447_p6, %p179_p9 }
   0xe   : > { %p216_p11 = scmp.lt.s32.totalorder (!%p180_p10), %s592_s15, 1  ;;  %v602_v0 = vmov (!%p180_p10), 0.0   ;;  %v603_v1 = vmov (!%p180_p10), 0   ;;  %vm248_vm0 = vcmask (!%p180_p10), 1043456   ;;  %vm244_vm1 = vcmask (!%p180_p10), 31744   ;;  %s212_s10 = sand.u32 (!%p180_p10), 1, %s584_s13  }
   0xf   : > { %183 = sbr.rel (%p180_p10) target bundleno = 260 (0x104), region = 32  ;;  %317 = vmatprep.mubr.f32.mxu0 (!%p180_p10), %v602_v0  ;;  %520 = vset.pattern.permute.xlu0 (!%p180_p10), %v603_v1  ;;  %s448_s11 = sshll.u32 (!%p180_p10), %s212_s10, 4 }
  0x10   : > { %s462_s18 = sshll.u32 (!%p180_p10), %s592_s15, 8  ;;  %s214_s19 = scalar_lea.vmem (!%p180_p10), [#allocation2], %s448_s11 }
  0x11   : > { %s343_s21 = sshll.u32 (!%p180_p10), %s214_s19, 4  ;;  %s327_s28 = scalar_lea.sflag (!%p180_p10), [#allocation3], %s212_s10  ;;  %s698_s21 = int_to_ptr.vmem [resolvable:$true] %s343_s21 }
  0x12   : > { %s604_s29 = smov (!%p180_p10), [#allocation2]  }
  0x16   : > { %s217_s26 = scalar_select %p216_p11, %s592_s15, 1 }
  0x17   : > { %s522_s15 = scalar_lea.vmem %s698_s21, 256 }
  0x18   : > { %s461_s27 = sshll.u32 %s217_s26, 3  ;;  %p523_p12 = scmp.ne.s32.totalorder %s698_s21, %s522_s15 }
  0x19   : > { %s223_s30 = scalar_lea.vmem %s743_s0, %s461_s27  ;;  %s228_s6 = scalar_lea.vmem %s744_s1, %s461_s27 }
  0x1a   : > { %v235_v2 = vld [vmem:[%s223_s30] sm:$0xff]  ;;  %s232_s9 = scalar_lea.vmem %s745_s2, %s461_s27  ;;  %s696_s27 = scalar_lea.hbm %s746_s3, %s462_s18 }
  0x1b   : > { %v243_v3 = vcombine.high %v235_v2, %v235_v2  ;;  %v236_v4 = vld [vmem:[%s232_s9] sm:$0xff]  ;;  %p524_p13 = pnand %p523_p12, %p665_p4  ;;  %s526_s30 = sshll.u32 %s604_s29, 4  ;;  %s527_s30 = int_to_ptr.vmem [resolvable:$false] %s526_s30 }
  0x1c   : > { %v234_v5 = vld [vmem:[%s228_s6] sm:$0xff]  ;;  %239 = vperm.xlu0 %520, %v236_v4   ;;  %s528_s4 = scalar_lea.vmem %s527_s30, 512  ;;  %p529_p1 = scmp.lt.s32.totalorder %s698_s21, %s527_s30 }
  0x1d   : > { %453 = vmatprep.subr.msk.mxu0 %vm248_vm0, %v243_v3  ;;  %p525_p0 = pneg %p524_p13  ;;  %p530_p2 = scmp.lt.s32.totalorder %s528_s4, %s522_s15 }
  0x1e   : > { %454 = vmatpush1.msk.msra.mxu0 %vm248_vm0, %v235_v2 }
  0x1f   : > { %455 = vmatmul.mubr.msk.f32.vlgmr.msra.gmra.mrb[0].mxu0 %vm244_vm1, %v234_v5  ;;  %p531_p3 = por %p530_p2, %p529_p1 }
  0x21   : > { %p532_p5 = pnand %p531_p3, %p525_p0 }
  0x9b   : > { %v240_v6 = vpop.permute.xlu0 %239 }
  0xf2   : > { %v319_v7 = vpop.f32.mrb[0].mxu0 }
  0xf3   : > { %v320_v8 = vadd.f32 %v319_v7, %v240_v6  ;;  %v321_v9 = vpop.f32.mrb[1].mxu0 }
  0xf4   : > { %v322_v10 = vadd.f32 %v321_v9, %v240_v6 }
  0xf5   : > { %324 = vst [vmem:[%s214_s19] sm:$0xff] %v320_v8 }
  0xf6   : > { %325 = vst [vmem:[%s214_s19 + $0x8] sm:$0xff] %v322_v10 }
  0xf7   : > { %535 = shalt.err (!%p532_p5)
}
  0xf8   : > { %s536_s5 = scalar_lea.hbm %s696_s27, 256  ;;  %s540_s8 = scalar_lea.hbm %s746_s3, 512 }
  0xf9   : > { %p537_p6 = scmp.ne.s32.totalorder %s696_s27, %s536_s5  ;;  %p541_p10 = scmp.lt.u32.totalorder %s696_s27, %s746_s3 }
  0xfa   : > { %p542_p11 = scmp.lt.u32.totalorder %s540_s8, %s536_s5  ;;  %p544_p13 = scmp.lt.u32.totalorder %s536_s5, %s696_s27 }
  0xfb   : > { %p538_p7 = pnand %p537_p6, %p665_p4 }
  0xfc   : > { %p543_p12 = por %p542_p11, %p541_p10 }
  0xfd   : > { %p539_p9 = pneg %p538_p7 }
  0xfe   : > { %p545_p0 = por %p544_p13, %p543_p12 }
 0x100   : > { %p546_p1 = pnand %p545_p0, %p539_p9 }
 0x102   : > { %549 = shalt.err (!%p546_p1)
}
 0x103   : > { %463 = dma.vmem_to_hbm [thread:$0]  (%p665_p4), %s698_s21, 256, %s696_s27, %s327_s28  }
 0x104 PF: > { %p469_p2 = scmp.ge.s32.totalorder %s600_s17, 2  ;;  %s355_s11 = sand.u32 1, %s580_s12  }
 0x105   : > { %s356_s18 = scalar_lea.sflag [#allocation3], %s355_s11 }
 0x106   : > { %p466_p3 = pnand %p469_p2, %p672_p8 }
 0x108   : > { %575 = dma.done.wait (!%p466_p3), %s356_s18, 256  }
 0x109   : > { %577 = vsyncadd (!%p466_p3), %s356_s18, 4294967040  ;;  %s16_s17 = sadd.s32 1, %s600_s17   ;;  %s749_s12 = smov %s584_s13 }
 0x10a   : > { %p13_p5 = scmp.ge.s32.totalorder %s16_s17, 4   ;;  %s750_s13 = smov %s588_s14 }
 0x10b   : > { %s751_s14 = smov %s678_s25  ;;  %s752_s15 = smov %s596_s16 }
 0x10c   : > { %s753_s16 = smov %s755_s20  ;;  %15 = sbr.rel (!%p13_p5) target bundleno = 4 (0x4), region = 73 }
 0x113   :  { %361 = vsyncpa [#allocation3], 1 }
 0x114   :  { %363 = vsyncpa [#allocation3 + $0x1], 1 }

</bundles_post_ra>
